<compile_context>
chip_gen: v6e
topology: v6e:2x2x1
jax: 0.10.0
libtpu: 0.0.40
codegen_flags: <defaults>
</compile_context>

<pallas_src>
import functools

import jax
import jax.numpy as jnp
from jax.experimental import pallas as pl
from jax.experimental.pallas import tpu as pltpu


def _spec(block_shape, index_map, single_buffer=False):
    """BlockSpec helper; single-buffers constant-index (weight) streams."""
    if single_buffer:
        try:
            return pl.BlockSpec(block_shape, index_map,
                                pipeline_mode=pl.Buffered(1))
        except TypeError:  # older runtimes without pipeline_mode support
            return pl.BlockSpec(block_shape, index_map)
    return pl.BlockSpec(block_shape, index_map)


# ---------------------------------------------------------------------------
# Kernel 1: per-head q/k/v projection, run once per (batch, seq-tile).
# Inputs / outputs are head-major (1, H, s_tile, D); weights are true (D, D).
# ---------------------------------------------------------------------------
def qkv_project_kernel(q_ref, k_ref, v_ref, wq_ref, wk_ref, wv_ref,
                       qo_ref, ko_ref, vo_ref, *, heads):
    bf16 = jnp.bfloat16
    for h in range(heads):
        qo_ref[0, h] = jnp.dot(q_ref[0, h], wq_ref[...],
                               preferred_element_type=jnp.float32).astype(bf16)
        ko_ref[0, h] = jnp.dot(k_ref[0, h], wk_ref[...],
                               preferred_element_type=jnp.float32).astype(bf16)
        vo_ref[0, h] = jnp.dot(v_ref[0, h], wv_ref[...],
                               preferred_element_type=jnp.float32).astype(bf16)


# ---------------------------------------------------------------------------
# Kernel 2: head-batched attention + fc_out + LN + FFN + LN.
# ---------------------------------------------------------------------------
def attention_ffn_kernel(
    q_res_ref,            # (1, tq, E)    f32  original query rows (residual)
    qp_ref,               # (1, H, tq, D) bf16 projected queries (scale folded)
    kp_ref,               # (1, H, S,  D) bf16 projected keys
    vp_ref,               # (1, H, S,  D) bf16 projected values
    bias_ref,             # (1, 1, tq, S) bf16 additive mask bias
    wo_ref, bo_ref,       # (H, D, E) bf16, (1, E) f32
    g1_ref, be1_ref,      # (1, E) f32
    w1_ref, b1_ref,       # (E, F) bf16, (1, F) f32
    w2_ref, b2_ref,       # (F, E) bf16, (1, E) f32
    g2_ref, be2_ref,      # (1, E) f32
    o_ref,                # (1, tq, E) f32
    *, heads,
):
    bf16 = jnp.bfloat16

    q_res = q_res_ref[0]                         # (tq, E) f32
    qp = qp_ref[0]                               # (H, tq, D) bf16
    kp = kp_ref[0]                               # (H, S,  D) bf16
    vp = vp_ref[0]                               # (H, S,  D) bf16
    bias = bias_ref[0, 0].astype(jnp.float32)    # (tq, S)

    # --- head-batched QK^T (scale already folded into Wq), softmax in f32.
    energy = jnp.einsum('hqd,hkd->hqk', qp, kp,
                        preferred_element_type=jnp.float32)        # (H, tq, S)
    energy = energy + bias                                          # bcast over H

    m = jnp.max(energy, axis=-1, keepdims=True)
    p = jnp.exp(energy - m)
    att = p * pl.reciprocal(jnp.sum(p, axis=-1, keepdims=True), approx=True)

    head_out = jnp.einsum('hqk,hkd->hqd', att.astype(bf16), vp,
                          preferred_element_type=jnp.float32)       # (H, tq, D)

    # --- fc_out: sum_h head_out[h] @ Wo[h*D:(h+1)*D, :]  (Wo pre-split (H,D,E))
    mha = jnp.dot(head_out[0].astype(bf16), wo_ref[0],
                  preferred_element_type=jnp.float32)
    for h in range(1, heads):
        mha = mha + jnp.dot(head_out[h].astype(bf16), wo_ref[h],
                            preferred_element_type=jnp.float32)
    mha = mha + bo_ref[...]                                         # (tq, E)

    # --- LayerNorm helper (f32).
    def layernorm(x, gamma, beta, eps=1e-5):
        mu = jnp.mean(x, axis=-1, keepdims=True)
        var = jnp.mean((x - mu) ** 2, axis=-1, keepdims=True)
        return (x - mu) * jax.lax.rsqrt(var + eps) * gamma + beta

    # TODO(synk): nn.Dropout treated as identity (inference / eval semantics).
    x1 = layernorm(mha + q_res, g1_ref[...], be1_ref[...])

    # --- FFN: bf16 matmuls, f32 accumulation / elementwise.
    # TODO(synk): for large E/F (v7x 64 MiB VMEM) tile the FFN over F-chunks
    # and stream K/V over S with an online-softmax inner loop.
    hdn = jnp.dot(x1.astype(bf16), w1_ref[...],
                  preferred_element_type=jnp.float32) + b1_ref[...]
    hdn = jnp.maximum(hdn, 0.0)                                     # ReLU
    ffo = jnp.dot(hdn.astype(bf16), w2_ref[...],
                  preferred_element_type=jnp.float32) + b2_ref[...]

    out = layernorm(ffo + x1, g2_ref[...], be2_ref[...])
    o_ref[0] = out.astype(o_ref.dtype)


def transformer_block(key_x, query_x, value_x, mask, params, *, heads,
                      q_tile=None, s_tile=None):
    N, S, E = query_x.shape
    H = heads
    D = E // H
    bf16 = jnp.bfloat16

    # q_tile: 128-256 on v5e, 256 (or 512 when S permits) on v6e/v7x.
    if q_tile is None:
        q_tile = min(S, 256)
    if s_tile is None:
        s_tile = min(S, 256)
    assert S % q_tile == 0 and S % s_tile == 0

    # (N, S, E) -> (N, H, S, D) bf16 head-major layout for all matmul operands;
    # the f32 residual / LayerNorm path uses the original query stream.
    def to_heads(x):
        return x.reshape(N, S, H, D).transpose(0, 2, 1, 3).astype(bf16)

    q_h, k_h, v_h = to_heads(query_x), to_heads(key_x), to_heads(value_x)

    # Fold the 1/sqrt(embedding_dim) softmax scale into Wq (one-time constant).
    wq = (params["wq"] * (1.0 / (E ** 0.5))).astype(bf16)
    wk = params["wk"].astype(bf16)
    wv = params["wv"].astype(bf16)

    # ---- kernel 1: project q/k/v once per row; emit bf16 head-major tensors.
    act_spec = pl.BlockSpec((1, H, s_tile, D), lambda n, si: (n, 0, si, 0))
    dd_spec = _spec((D, D), lambda n, si: (0, 0), single_buffer=True)

    q_p, k_p, v_p = pl.pallas_call(
        functools.partial(qkv_project_kernel, heads=H),
        out_shape=tuple(jax.ShapeDtypeStruct((N, H, S, D), bf16)
                        for _ in range(3)),
        grid_spec=pltpu.PrefetchScalarGridSpec(
            num_scalar_prefetch=0,
            grid=(N, S // s_tile),
            in_specs=[act_spec, act_spec, act_spec, dd_spec, dd_spec, dd_spec],
            out_specs=(act_spec, act_spec, act_spec),
        ),
        compiler_params=pltpu.CompilerParams(
            dimension_semantics=("parallel", "parallel")),
    )(q_h, k_h, v_h, wq, wk, wv)

    # Mask -> bf16 additive bias once in the wrapper (half the int32 DMA,
    # no per-step compare/select inside the kernel).
    bias = jnp.where(mask == 0, jnp.float32(-1e20), jnp.float32(0.0)).astype(bf16)

    # fc_out weight split per head: rows h*D..(h+1)*D of (E, E) -> (H, D, E).
    wo3 = params["wo"].reshape(H, D, E).astype(bf16)

    weights = [
        wo3, params["bo"], params["g1"], params["be1"],
        params["w1"].astype(bf16), params["b1"],
        params["w2"].astype(bf16), params["b2"],
        params["g2"], params["be2"],
    ]

    in_specs = [
        pl.BlockSpec((1, q_tile, E), lambda n, qi: (n, qi, 0)),        # residual q (f32)
        pl.BlockSpec((1, H, q_tile, D), lambda n, qi: (n, 0, qi, 0)),  # projected q (bf16)
        pl.BlockSpec((1, H, S, D), lambda n, qi: (n, 0, 0, 0)),        # projected k (bf16)
        pl.BlockSpec((1, H, S, D), lambda n, qi: (n, 0, 0, 0)),        # projected v (bf16)
        pl.BlockSpec((1, 1, q_tile, S), lambda n, qi: (n, 0, qi, 0)),  # mask bias (bf16)
    ]
    for w in weights:  # constant-index weights: single-buffered
        in_specs.append(_spec(w.shape, lambda n, qi, nd=w.ndim: (0,) * nd,
                              single_buffer=True))

    return pl.pallas_call(
        functools.partial(attention_ffn_kernel, heads=H),
        out_shape=jax.ShapeDtypeStruct((N, S, E), jnp.float32),
        grid_spec=pltpu.PrefetchScalarGridSpec(
            num_scalar_prefetch=0,
            grid=(N, S // q_tile),
            in_specs=in_specs,
            out_specs=pl.BlockSpec((1, q_tile, E), lambda n, qi: (n, qi, 0)),
        ),
        compiler_params=pltpu.CompilerParams(
            dimension_semantics=("parallel", "parallel"),
            # 48 MiB: leaves headroom on v7x (64 MiB physical); raise toward
            # ~100 MiB on v5e/v6e if bigger tiles are used.
            vmem_limit_bytes=48 * 1024 * 1024),
    )(query_x, q_p, k_p, v_p, bias, *weights)


# --- pure-JAX reference (mirrors the PyTorch forward, f32) -------------------
def reference(key_x, query_x, value_x, mask, params, *, heads):
    N, S, E = query_x.shape
    D = E // heads
    q = query_x.reshape(N, S, heads, D) @ params["wq"]
    k = key_x.reshape(N, S, heads, D) @ params["wk"]
    v = value_x.reshape(N, S, heads, D) @ params["wv"]
    energy = jnp.einsum("nqhd,nkhd->nhqk", q, k)
    energy = jnp.where(mask == 0, -1e20, energy)
    att = jax.nn.softmax(energy / (E ** 0.5), axis=3)
    attn = jnp.einsum("nhql,nlhd->nqhd", att, v).reshape(N, S, E)
    mha = attn @ params["wo"] + params["bo"]

    def ln(x, g, b, eps=1e-5):
        mu = x.mean(-1, keepdims=True)
        var = ((x - mu) ** 2).mean(-1, keepdims=True)
        return (x - mu) / jnp.sqrt(var + eps) * g + b

    x1 = ln(mha + query_x, params["g1"], params["be1"])
    h = jnp.maximum(x1 @ params["w1"] + params["b1"], 0.0)
    f = h @ params["w2"] + params["b2"]
    return ln(f + x1, params["g2"], params["be2"])


if __name__ == "__main__":
    N, S, E, H, FE = 2, 8, 32, 4, 4      # batch, seq, embedding, heads, expansion
    D = E // H
    F = FE * E

    root = jax.random.PRNGKey(0)
    ks = jax.random.split(root, 16)

    key_x = jax.random.normal(ks[0], (N, S, E), jnp.float32)
    query_x = jax.random.normal(ks[1], (N, S, E), jnp.float32)
    value_x = jax.random.normal(ks[2], (N, S, E), jnp.float32)
    # causal mask, broadcast over heads
    mask = jnp.broadcast_to(
        jnp.tril(jnp.ones((S, S), jnp.int32))[None, None], (N, 1, S, S))

    def w(k, shape, scale=0.1):
        return scale * jax.random.normal(k, shape, jnp.float32)

    # weights stored as (in, out) so the math is x @ W + b
    params = {
        "wq": w(ks[3], (D, D)),
        "wk": w(ks[4], (D, D)),
        "wv": w(ks[5], (D, D)),
        "wo": w(ks[6], (E, E)),
        "bo": w(ks[7], (1, E)),
        "g1": jnp.ones((1, E), jnp.float32),
        "be1": jnp.zeros((1, E), jnp.float32),
        "w1": w(ks[8], (E, F)),
        "b1": w(ks[9], (1, F)),
        "w2": w(ks[10], (F, E)),
        "b2": w(ks[11], (1, E)),
        "g2": jnp.ones((1, E), jnp.float32),
        "be2": jnp.zeros((1, E), jnp.float32),
    }

    out = transformer_block(key_x, query_x, value_x, mask, params, heads=H)
    out = jax.block_until_ready(out)

    ref = reference(key_x, query_x, value_x, mask, params, heads=H)
    assert out.shape == (N, S, E)
    # bf16 matmul operands vs. f32 reference -> standard bf16 tolerance
    assert jnp.allclose(out, ref, atol=2e-2, rtol=2e-2), "mismatch vs reference"

    print("KERNEL_OK")
</pallas_src>

<mosaic_0001>
module attributes {stable_mosaic.version = 11 : i64} {
  func.func @qkv_project_kernel(%arg0: i32, %arg1: i32, %arg2: memref<1x4x8x8xbf16, #tpu.memory_space<vmem>>, %arg3: memref<1x4x8x8xbf16, #tpu.memory_space<vmem>>, %arg4: memref<1x4x8x8xbf16, #tpu.memory_space<vmem>>, %arg5: memref<8x8xbf16, #tpu.memory_space<vmem>>, %arg6: memref<8x8xbf16, #tpu.memory_space<vmem>>, %arg7: memref<8x8xbf16, #tpu.memory_space<vmem>>, %arg8: memref<1x4x8x8xbf16, #tpu.memory_space<vmem>>, %arg9: memref<1x4x8x8xbf16, #tpu.memory_space<vmem>>, %arg10: memref<1x4x8x8xbf16, #tpu.memory_space<vmem>>) attributes {dimension_semantics = [#tpu.dimension_semantics<parallel>, #tpu.dimension_semantics<parallel>], iteration_bounds = array<i64: 2, 1>, scalar_prefetch = 0 : i64, scratch_operands = 0 : i64, tpu.core_type = #tpu.core_type<tc>, window_params = [{transform_indices = @transform_0, window_bounds = array<i64: 1, 4, 8, 8>}, {transform_indices = @transform_1, window_bounds = array<i64: 1, 4, 8, 8>}, {transform_indices = @transform_2, window_bounds = array<i64: 1, 4, 8, 8>}, {pipeline_mode = #tpu.pipeline_mode<synchronous>, transform_indices = @transform_3, window_bounds = array<i64: 8, 8>}, {pipeline_mode = #tpu.pipeline_mode<synchronous>, transform_indices = @transform_4, window_bounds = array<i64: 8, 8>}, {pipeline_mode = #tpu.pipeline_mode<synchronous>, transform_indices = @transform_5, window_bounds = array<i64: 8, 8>}, {transform_indices = @transform_6, window_bounds = array<i64: 1, 4, 8, 8>}, {transform_indices = @transform_7, window_bounds = array<i64: 1, 4, 8, 8>}, {transform_indices = @transform_8, window_bounds = array<i64: 1, 4, 8, 8>}]} {
    %c0 = arith.constant 0 : index
    %c0_0 = arith.constant 0 : index
    %c0_1 = arith.constant 0 : index
    %c0_2 = arith.constant 0 : index
    %0 = vector.load %arg2[%c0, %c0_0, %c0_1, %c0_2] : memref<1x4x8x8xbf16, #tpu.memory_space<vmem>>, vector<1x1x8x8xbf16>
    %1 = vector.shape_cast %0 : vector<1x1x8x8xbf16> to vector<8x8xbf16>
    %c0_3 = arith.constant 0 : index
    %c0_4 = arith.constant 0 : index
    %2 = vector.load %arg5[%c0_3, %c0_4] : memref<8x8xbf16, #tpu.memory_space<vmem>>, vector<8x8xbf16>
    %cst = arith.constant dense<0.000000e+00> : vector<8x8xf32>
    %3 = tpu.matmul %1, %2, %cst {dimension_numbers = #tpu.dot_dimension_numbers<[1], [0], [0], [1], [0, 0, 1, 1], [], []>} : vector<8x8xbf16>, vector<8x8xbf16>, vector<8x8xf32> -> vector<8x8xf32>
    %4 = arith.truncf %3 : vector<8x8xf32> to vector<8x8xbf16>
    %c0_5 = arith.constant 0 : index
    %c0_6 = arith.constant 0 : index
    %c0_7 = arith.constant 0 : index
    %c0_8 = arith.constant 0 : index
    %5 = vector.load %arg8[%c0_5, %c0_6, %c0_7, %c0_8] : memref<1x4x8x8xbf16, #tpu.memory_space<vmem>>, vector<1x1x8x8xbf16>
    %6 = vector.shape_cast %5 : vector<1x1x8x8xbf16> to vector<8x8xbf16>
    %7 = vector.shape_cast %4 : vector<8x8xbf16> to vector<1x1x8x8xbf16>
    tpu.vector_store %arg8[%c0_5, %c0_6, %c0_7, %c0_8], %7 {strides = array<i32>} : memref<1x4x8x8xbf16, #tpu.memory_space<vmem>>, vector<1x1x8x8xbf16>,
    %c0_9 = arith.constant 0 : index
    %c0_10 = arith.constant 0 : index
    %c0_11 = arith.constant 0 : index
    %c0_12 = arith.constant 0 : index
    %8 = vector.load %arg3[%c0_9, %c0_10, %c0_11, %c0_12] : memref<1x4x8x8xbf16, #tpu.memory_space<vmem>>, vector<1x1x8x8xbf16>
    %9 = vector.shape_cast %8 : vector<1x1x8x8xbf16> to vector<8x8xbf16>
    %c0_13 = arith.constant 0 : index
    %c0_14 = arith.constant 0 : index
    %10 = vector.load %arg6[%c0_13, %c0_14] : memref<8x8xbf16, #tpu.memory_space<vmem>>, vector<8x8xbf16>
    %cst_15 = arith.constant dense<0.000000e+00> : vector<8x8xf32>
    %11 = tpu.matmul %9, %10, %cst_15 {dimension_numbers = #tpu.dot_dimension_numbers<[1], [0], [0], [1], [0, 0, 1, 1], [], []>} : vector<8x8xbf16>, vector<8x8xbf16>, vector<8x8xf32> -> vector<8x8xf32>
    %12 = arith.truncf %11 : vector<8x8xf32> to vector<8x8xbf16>
    %c0_16 = arith.constant 0 : index
    %c0_17 = arith.constant 0 : index
    %c0_18 = arith.constant 0 : index
    %c0_19 = arith.constant 0 : index
    %13 = vector.load %arg9[%c0_16, %c0_17, %c0_18, %c0_19] : memref<1x4x8x8xbf16, #tpu.memory_space<vmem>>, vector<1x1x8x8xbf16>
    %14 = vector.shape_cast %13 : vector<1x1x8x8xbf16> to vector<8x8xbf16>
    %15 = vector.shape_cast %12 : vector<8x8xbf16> to vector<1x1x8x8xbf16>
    tpu.vector_store %arg9[%c0_16, %c0_17, %c0_18, %c0_19], %15 {strides = array<i32>} : memref<1x4x8x8xbf16, #tpu.memory_space<vmem>>, vector<1x1x8x8xbf16>,
    %c0_20 = arith.constant 0 : index
    %c0_21 = arith.constant 0 : index
    %c0_22 = arith.constant 0 : index
    %c0_23 = arith.constant 0 : index
    %16 = vector.load %arg4[%c0_20, %c0_21, %c0_22, %c0_23] : memref<1x4x8x8xbf16, #tpu.memory_space<vmem>>, vector<1x1x8x8xbf16>
    %17 = vector.shape_cast %16 : vector<1x1x8x8xbf16> to vector<8x8xbf16>
    %c0_24 = arith.constant 0 : index
    %c0_25 = arith.constant 0 : index
    %18 = vector.load %arg7[%c0_24, %c0_25] : memref<8x8xbf16, #tpu.memory_space<vmem>>, vector<8x8xbf16>
    %cst_26 = arith.constant dense<0.000000e+00> : vector<8x8xf32>
    %19 = tpu.matmul %17, %18, %cst_26 {dimension_numbers = #tpu.dot_dimension_numbers<[1], [0], [0], [1], [0, 0, 1, 1], [], []>} : vector<8x8xbf16>, vector<8x8xbf16>, vector<8x8xf32> -> vector<8x8xf32>
    %20 = arith.truncf %19 : vector<8x8xf32> to vector<8x8xbf16>
    %c0_27 = arith.constant 0 : index
    %c0_28 = arith.constant 0 : index
    %c0_29 = arith.constant 0 : index
    %c0_30 = arith.constant 0 : index
    %21 = vector.load %arg10[%c0_27, %c0_28, %c0_29, %c0_30] : memref<1x4x8x8xbf16, #tpu.memory_space<vmem>>, vector<1x1x8x8xbf16>
    %22 = vector.shape_cast %21 : vector<1x1x8x8xbf16> to vector<8x8xbf16>
    %23 = vector.shape_cast %20 : vector<8x8xbf16> to vector<1x1x8x8xbf16>
    tpu.vector_store %arg10[%c0_27, %c0_28, %c0_29, %c0_30], %23 {strides = array<i32>} : memref<1x4x8x8xbf16, #tpu.memory_space<vmem>>, vector<1x1x8x8xbf16>,
    %c0_31 = arith.constant 0 : index
    %c1 = arith.constant 1 : index
    %c0_32 = arith.constant 0 : index
    %c0_33 = arith.constant 0 : index
    %24 = vector.load %arg2[%c0_31, %c1, %c0_32, %c0_33] : memref<1x4x8x8xbf16, #tpu.memory_space<vmem>>, vector<1x1x8x8xbf16>
    %25 = vector.shape_cast %24 : vector<1x1x8x8xbf16> to vector<8x8xbf16>
    %c0_34 = arith.constant 0 : index
    %c0_35 = arith.constant 0 : index
    %26 = vector.load %arg5[%c0_34, %c0_35] : memref<8x8xbf16, #tpu.memory_space<vmem>>, vector<8x8xbf16>
    %cst_36 = arith.constant dense<0.000000e+00> : vector<8x8xf32>
    %27 = tpu.matmul %25, %26, %cst_36 {dimension_numbers = #tpu.dot_dimension_numbers<[1], [0], [0], [1], [0, 0, 1, 1], [], []>} : vector<8x8xbf16>, vector<8x8xbf16>, vector<8x8xf32> -> vector<8x8xf32>
    %28 = arith.truncf %27 : vector<8x8xf32> to vector<8x8xbf16>
    %c0_37 = arith.constant 0 : index
    %c1_38 = arith.constant 1 : index
    %c0_39 = arith.constant 0 : index
    %c0_40 = arith.constant 0 : index
    %29 = vector.load %arg8[%c0_37, %c1_38, %c0_39, %c0_40] : memref<1x4x8x8xbf16, #tpu.memory_space<vmem>>, vector<1x1x8x8xbf16>
    %30 = vector.shape_cast %29 : vector<1x1x8x8xbf16> to vector<8x8xbf16>
    %31 = vector.shape_cast %28 : vector<8x8xbf16> to vector<1x1x8x8xbf16>
    tpu.vector_store %arg8[%c0_37, %c1_38, %c0_39, %c0_40], %31 {strides = array<i32>} : memref<1x4x8x8xbf16, #tpu.memory_space<vmem>>, vector<1x1x8x8xbf16>,
    %c0_41 = arith.constant 0 : index
    %c1_42 = arith.constant 1 : index
    %c0_43 = arith.constant 0 : index
    %c0_44 = arith.constant 0 : index
    %32 = vector.load %arg3[%c0_41, %c1_42, %c0_43, %c0_44] : memref<1x4x8x8xbf16, #tpu.memory_space<vmem>>, vector<1x1x8x8xbf16>
    %33 = vector.shape_cast %32 : vector<1x1x8x8xbf16> to vector<8x8xbf16>
    %c0_45 = arith.constant 0 : index
    %c0_46 = arith.constant 0 : index
    %34 = vector.load %arg6[%c0_45, %c0_46] : memref<8x8xbf16, #tpu.memory_space<vmem>>, vector<8x8xbf16>
    %cst_47 = arith.constant dense<0.000000e+00> : vector<8x8xf32>
    %35 = tpu.matmul %33, %34, %cst_47 {dimension_numbers = #tpu.dot_dimension_numbers<[1], [0], [0], [1], [0, 0, 1, 1], [], []>} : vector<8x8xbf16>, vector<8x8xbf16>, vector<8x8xf32> -> vector<8x8xf32>
    %36 = arith.truncf %35 : vector<8x8xf32> to vector<8x8xbf16>
    %c0_48 = arith.constant 0 : index
    %c1_49 = arith.constant 1 : index
    %c0_50 = arith.constant 0 : index
    %c0_51 = arith.constant 0 : index
    %37 = vector.load %arg9[%c0_48, %c1_49, %c0_50, %c0_51] : memref<1x4x8x8xbf16, #tpu.memory_space<vmem>>, vector<1x1x8x8xbf16>
    %38 = vector.shape_cast %37 : vector<1x1x8x8xbf16> to vector<8x8xbf16>
    %39 = vector.shape_cast %36 : vector<8x8xbf16> to vector<1x1x8x8xbf16>
    tpu.vector_store %arg9[%c0_48, %c1_49, %c0_50, %c0_51], %39 {strides = array<i32>} : memref<1x4x8x8xbf16, #tpu.memory_space<vmem>>, vector<1x1x8x8xbf16>,
    %c0_52 = arith.constant 0 : index
    %c1_53 = arith.constant 1 : index
    %c0_54 = arith.constant 0 : index
    %c0_55 = arith.constant 0 : index
    %40 = vector.load %arg4[%c0_52, %c1_53, %c0_54, %c0_55] : memref<1x4x8x8xbf16, #tpu.memory_space<vmem>>, vector<1x1x8x8xbf16>
    %41 = vector.shape_cast %40 : vector<1x1x8x8xbf16> to vector<8x8xbf16>
    %c0_56 = arith.constant 0 : index
    %c0_57 = arith.constant 0 : index
    %42 = vector.load %arg7[%c0_56, %c0_57] : memref<8x8xbf16, #tpu.memory_space<vmem>>, vector<8x8xbf16>
    %cst_58 = arith.constant dense<0.000000e+00> : vector<8x8xf32>
    %43 = tpu.matmul %41, %42, %cst_58 {dimension_numbers = #tpu.dot_dimension_numbers<[1], [0], [0], [1], [0, 0, 1, 1], [], []>} : vector<8x8xbf16>, vector<8x8xbf16>, vector<8x8xf32> -> vector<8x8xf32>
    %44 = arith.truncf %43 : vector<8x8xf32> to vector<8x8xbf16>
    %c0_59 = arith.constant 0 : index
    %c1_60 = arith.constant 1 : index
    %c0_61 = arith.constant 0 : index
    %c0_62 = arith.constant 0 : index
    %45 = vector.load %arg10[%c0_59, %c1_60, %c0_61, %c0_62] : memref<1x4x8x8xbf16, #tpu.memory_space<vmem>>, vector<1x1x8x8xbf16>
    %46 = vector.shape_cast %45 : vector<1x1x8x8xbf16> to vector<8x8xbf16>
    %47 = vector.shape_cast %44 : vector<8x8xbf16> to vector<1x1x8x8xbf16>
    tpu.vector_store %arg10[%c0_59, %c1_60, %c0_61, %c0_62], %47 {strides = array<i32>} : memref<1x4x8x8xbf16, #tpu.memory_space<vmem>>, vector<1x1x8x8xbf16>,
    %c0_63 = arith.constant 0 : index
    %c2 = arith.constant 2 : index
    %c0_64 = arith.constant 0 : index
    %c0_65 = arith.constant 0 : index
    %48 = vector.load %arg2[%c0_63, %c2, %c0_64, %c0_65] : memref<1x4x8x8xbf16, #tpu.memory_space<vmem>>, vector<1x1x8x8xbf16>
    %49 = vector.shape_cast %48 : vector<1x1x8x8xbf16> to vector<8x8xbf16>
    %c0_66 = arith.constant 0 : index
    %c0_67 = arith.constant 0 : index
    %50 = vector.load %arg5[%c0_66, %c0_67] : memref<8x8xbf16, #tpu.memory_space<vmem>>, vector<8x8xbf16>
    %cst_68 = arith.constant dense<0.000000e+00> : vector<8x8xf32>
    %51 = tpu.matmul %49, %50, %cst_68 {dimension_numbers = #tpu.dot_dimension_numbers<[1], [0], [0], [1], [0, 0, 1, 1], [], []>} : vector<8x8xbf16>, vector<8x8xbf16>, vector<8x8xf32> -> vector<8x8xf32>
    %52 = arith.truncf %51 : vector<8x8xf32> to vector<8x8xbf16>
    %c0_69 = arith.constant 0 : index
    %c2_70 = arith.constant 2 : index
    %c0_71 = arith.constant 0 : index
    %c0_72 = arith.constant 0 : index
    %53 = vector.load %arg8[%c0_69, %c2_70, %c0_71, %c0_72] : memref<1x4x8x8xbf16, #tpu.memory_space<vmem>>, vector<1x1x8x8xbf16>
    %54 = vector.shape_cast %53 : vector<1x1x8x8xbf16> to vector<8x8xbf16>
    %55 = vector.shape_cast %52 : vector<8x8xbf16> to vector<1x1x8x8xbf16>
    tpu.vector_store %arg8[%c0_69, %c2_70, %c0_71, %c0_72], %55 {strides = array<i32>} : memref<1x4x8x8xbf16, #tpu.memory_space<vmem>>, vector<1x1x8x8xbf16>,
    %c0_73 = arith.constant 0 : index
    %c2_74 = arith.constant 2 : index
    %c0_75 = arith.constant 0 : index
    %c0_76 = arith.constant 0 : index
    %56 = vector.load %arg3[%c0_73, %c2_74, %c0_75, %c0_76] : memref<1x4x8x8xbf16, #tpu.memory_space<vmem>>, vector<1x1x8x8xbf16>
    %57 = vector.shape_cast %56 : vector<1x1x8x8xbf16> to vector<8x8xbf16>
    %c0_77 = arith.constant 0 : index
    %c0_78 = arith.constant 0 : index
    %58 = vector.load %arg6[%c0_77, %c0_78] : memref<8x8xbf16, #tpu.memory_space<vmem>>, vector<8x8xbf16>
    %cst_79 = arith.constant dense<0.000000e+00> : vector<8x8xf32>
    %59 = tpu.matmul %57, %58, %cst_79 {dimension_numbers = #tpu.dot_dimension_numbers<[1], [0], [0], [1], [0, 0, 1, 1], [], []>} : vector<8x8xbf16>, vector<8x8xbf16>, vector<8x8xf32> -> vector<8x8xf32>
    %60 = arith.truncf %59 : vector<8x8xf32> to vector<8x8xbf16>
    %c0_80 = arith.constant 0 : index
    %c2_81 = arith.constant 2 : index
    %c0_82 = arith.constant 0 : index
    %c0_83 = arith.constant 0 : index
    %61 = vector.load %arg9[%c0_80, %c2_81, %c0_82, %c0_83] : memref<1x4x8x8xbf16, #tpu.memory_space<vmem>>, vector<1x1x8x8xbf16>
    %62 = vector.shape_cast %61 : vector<1x1x8x8xbf16> to vector<8x8xbf16>
    %63 = vector.shape_cast %60 : vector<8x8xbf16> to vector<1x1x8x8xbf16>
    tpu.vector_store %arg9[%c0_80, %c2_81, %c0_82, %c0_83], %63 {strides = array<i32>} : memref<1x4x8x8xbf16, #tpu.memory_space<vmem>>, vector<1x1x8x8xbf16>,
    %c0_84 = arith.constant 0 : index
    %c2_85 = arith.constant 2 : index
    %c0_86 = arith.constant 0 : index
    %c0_87 = arith.constant 0 : index
    %64 = vector.load %arg4[%c0_84, %c2_85, %c0_86, %c0_87] : memref<1x4x8x8xbf16, #tpu.memory_space<vmem>>, vector<1x1x8x8xbf16>
    %65 = vector.shape_cast %64 : vector<1x1x8x8xbf16> to vector<8x8xbf16>
    %c0_88 = arith.constant 0 : index
    %c0_89 = arith.constant 0 : index
    %66 = vector.load %arg7[%c0_88, %c0_89] : memref<8x8xbf16, #tpu.memory_space<vmem>>, vector<8x8xbf16>
    %cst_90 = arith.constant dense<0.000000e+00> : vector<8x8xf32>
    %67 = tpu.matmul %65, %66, %cst_90 {dimension_numbers = #tpu.dot_dimension_numbers<[1], [0], [0], [1], [0, 0, 1, 1], [], []>} : vector<8x8xbf16>, vector<8x8xbf16>, vector<8x8xf32> -> vector<8x8xf32>
    %68 = arith.truncf %67 : vector<8x8xf32> to vector<8x8xbf16>
    %c0_91 = arith.constant 0 : index
    %c2_92 = arith.constant 2 : index
    %c0_93 = arith.constant 0 : index
    %c0_94 = arith.constant 0 : index
    %69 = vector.load %arg10[%c0_91, %c2_92, %c0_93, %c0_94] : memref<1x4x8x8xbf16, #tpu.memory_space<vmem>>, vector<1x1x8x8xbf16>
    %70 = vector.shape_cast %69 : vector<1x1x8x8xbf16> to vector<8x8xbf16>
    %71 = vector.shape_cast %68 : vector<8x8xbf16> to vector<1x1x8x8xbf16>
    tpu.vector_store %arg10[%c0_91, %c2_92, %c0_93, %c0_94], %71 {strides = array<i32>} : memref<1x4x8x8xbf16, #tpu.memory_space<vmem>>, vector<1x1x8x8xbf16>,
    %c0_95 = arith.constant 0 : index
    %c3 = arith.constant 3 : index
    %c0_96 = arith.constant 0 : index
    %c0_97 = arith.constant 0 : index
    %72 = vector.load %arg2[%c0_95, %c3, %c0_96, %c0_97] : memref<1x4x8x8xbf16, #tpu.memory_space<vmem>>, vector<1x1x8x8xbf16>
    %73 = vector.shape_cast %72 : vector<1x1x8x8xbf16> to vector<8x8xbf16>
    %c0_98 = arith.constant 0 : index
    %c0_99 = arith.constant 0 : index
    %74 = vector.load %arg5[%c0_98, %c0_99] : memref<8x8xbf16, #tpu.memory_space<vmem>>, vector<8x8xbf16>
    %cst_100 = arith.constant dense<0.000000e+00> : vector<8x8xf32>
    %75 = tpu.matmul %73, %74, %cst_100 {dimension_numbers = #tpu.dot_dimension_numbers<[1], [0], [0], [1], [0, 0, 1, 1], [], []>} : vector<8x8xbf16>, vector<8x8xbf16>, vector<8x8xf32> -> vector<8x8xf32>
    %76 = arith.truncf %75 : vector<8x8xf32> to vector<8x8xbf16>
    %c0_101 = arith.constant 0 : index
    %c3_102 = arith.constant 3 : index
    %c0_103 = arith.constant 0 : index
    %c0_104 = arith.constant 0 : index
    %77 = vector.load %arg8[%c0_101, %c3_102, %c0_103, %c0_104] : memref<1x4x8x8xbf16, #tpu.memory_space<vmem>>, vector<1x1x8x8xbf16>
    %78 = vector.shape_cast %77 : vector<1x1x8x8xbf16> to vector<8x8xbf16>
    %79 = vector.shape_cast %76 : vector<8x8xbf16> to vector<1x1x8x8xbf16>
    tpu.vector_store %arg8[%c0_101, %c3_102, %c0_103, %c0_104], %79 {strides = array<i32>} : memref<1x4x8x8xbf16, #tpu.memory_space<vmem>>, vector<1x1x8x8xbf16>,
    %c0_105 = arith.constant 0 : index
    %c3_106 = arith.constant 3 : index
    %c0_107 = arith.constant 0 : index
    %c0_108 = arith.constant 0 : index
    %80 = vector.load %arg3[%c0_105, %c3_106, %c0_107, %c0_108] : memref<1x4x8x8xbf16, #tpu.memory_space<vmem>>, vector<1x1x8x8xbf16>
    %81 = vector.shape_cast %80 : vector<1x1x8x8xbf16> to vector<8x8xbf16>
    %c0_109 = arith.constant 0 : index
    %c0_110 = arith.constant 0 : index
    %82 = vector.load %arg6[%c0_109, %c0_110] : memref<8x8xbf16, #tpu.memory_space<vmem>>, vector<8x8xbf16>
    %cst_111 = arith.constant dense<0.000000e+00> : vector<8x8xf32>
    %83 = tpu.matmul %81, %82, %cst_111 {dimension_numbers = #tpu.dot_dimension_numbers<[1], [0], [0], [1], [0, 0, 1, 1], [], []>} : vector<8x8xbf16>, vector<8x8xbf16>, vector<8x8xf32> -> vector<8x8xf32>
    %84 = arith.truncf %83 : vector<8x8xf32> to vector<8x8xbf16>
    %c0_112 = arith.constant 0 : index
    %c3_113 = arith.constant 3 : index
    %c0_114 = arith.constant 0 : index
    %c0_115 = arith.constant 0 : index
    %85 = vector.load %arg9[%c0_112, %c3_113, %c0_114, %c0_115] : memref<1x4x8x8xbf16, #tpu.memory_space<vmem>>, vector<1x1x8x8xbf16>
    %86 = vector.shape_cast %85 : vector<1x1x8x8xbf16> to vector<8x8xbf16>
    %87 = vector.shape_cast %84 : vector<8x8xbf16> to vector<1x1x8x8xbf16>
    tpu.vector_store %arg9[%c0_112, %c3_113, %c0_114, %c0_115], %87 {strides = array<i32>} : memref<1x4x8x8xbf16, #tpu.memory_space<vmem>>, vector<1x1x8x8xbf16>,
    %c0_116 = arith.constant 0 : index
    %c3_117 = arith.constant 3 : index
    %c0_118 = arith.constant 0 : index
    %c0_119 = arith.constant 0 : index
    %88 = vector.load %arg4[%c0_116, %c3_117, %c0_118, %c0_119] : memref<1x4x8x8xbf16, #tpu.memory_space<vmem>>, vector<1x1x8x8xbf16>
    %89 = vector.shape_cast %88 : vector<1x1x8x8xbf16> to vector<8x8xbf16>
    %c0_120 = arith.constant 0 : index
    %c0_121 = arith.constant 0 : index
    %90 = vector.load %arg7[%c0_120, %c0_121] : memref<8x8xbf16, #tpu.memory_space<vmem>>, vector<8x8xbf16>
    %cst_122 = arith.constant dense<0.000000e+00> : vector<8x8xf32>
    %91 = tpu.matmul %89, %90, %cst_122 {dimension_numbers = #tpu.dot_dimension_numbers<[1], [0], [0], [1], [0, 0, 1, 1], [], []>} : vector<8x8xbf16>, vector<8x8xbf16>, vector<8x8xf32> -> vector<8x8xf32>
    %92 = arith.truncf %91 : vector<8x8xf32> to vector<8x8xbf16>
    %c0_123 = arith.constant 0 : index
    %c3_124 = arith.constant 3 : index
    %c0_125 = arith.constant 0 : index
    %c0_126 = arith.constant 0 : index
    %93 = vector.load %arg10[%c0_123, %c3_124, %c0_125, %c0_126] : memref<1x4x8x8xbf16, #tpu.memory_space<vmem>>, vector<1x1x8x8xbf16>
    %94 = vector.shape_cast %93 : vector<1x1x8x8xbf16> to vector<8x8xbf16>
    %95 = vector.shape_cast %92 : vector<8x8xbf16> to vector<1x1x8x8xbf16>
    tpu.vector_store %arg10[%c0_123, %c3_124, %c0_125, %c0_126], %95 {strides = array<i32>} : memref<1x4x8x8xbf16, #tpu.memory_space<vmem>>, vector<1x1x8x8xbf16>,
    return
  }
  func.func @transform_0(%arg0: i32, %arg1: i32) -> (i32, i32, i32, i32) {
    %c0_i32 = arith.constant 0 : i32
    %c0_i32_0 = arith.constant 0 : i32
    %c0_i32_1 = arith.constant 0 : i32
    return %arg0, %c0_i32, %arg1, %c0_i32_0 : i32, i32, i32, i32
  }
  func.func @transform_1(%arg0: i32, %arg1: i32) -> (i32, i32, i32, i32) {
    %c0_i32 = arith.constant 0 : i32
    %c0_i32_0 = arith.constant 0 : i32
    %c0_i32_1 = arith.constant 0 : i32
    return %arg0, %c0_i32, %arg1, %c0_i32_0 : i32, i32, i32, i32
  }
  func.func @transform_2(%arg0: i32, %arg1: i32) -> (i32, i32, i32, i32) {
    %c0_i32 = arith.constant 0 : i32
    %c0_i32_0 = arith.constant 0 : i32
    %c0_i32_1 = arith.constant 0 : i32
    return %arg0, %c0_i32, %arg1, %c0_i32_0 : i32, i32, i32, i32
  }
  func.func @transform_3(%arg0: i32, %arg1: i32) -> (i32, i32) {
    %c0_i32 = arith.constant 0 : i32
    %c0_i32_0 = arith.constant 0 : i32
    %c0_i32_1 = arith.constant 0 : i32
    return %c0_i32, %c0_i32_0 : i32, i32
  }
  func.func @transform_4(%arg0: i32, %arg1: i32) -> (i32, i32) {
    %c0_i32 = arith.constant 0 : i32
    %c0_i32_0 = arith.constant 0 : i32
    %c0_i32_1 = arith.constant 0 : i32
    return %c0_i32, %c0_i32_0 : i32, i32
  }
  func.func @transform_5(%arg0: i32, %arg1: i32) -> (i32, i32) {
    %c0_i32 = arith.constant 0 : i32
    %c0_i32_0 = arith.constant 0 : i32
    %c0_i32_1 = arith.constant 0 : i32
    return %c0_i32, %c0_i32_0 : i32, i32
  }
  func.func @transform_6(%arg0: i32, %arg1: i32) -> (i32, i32, i32, i32) {
    %c0_i32 = arith.constant 0 : i32
    %c0_i32_0 = arith.constant 0 : i32
    %c0_i32_1 = arith.constant 0 : i32
    return %arg0, %c0_i32, %arg1, %c0_i32_0 : i32, i32, i32, i32
  }
  func.func @transform_7(%arg0: i32, %arg1: i32) -> (i32, i32, i32, i32) {
    %c0_i32 = arith.constant 0 : i32
    %c0_i32_0 = arith.constant 0 : i32
    %c0_i32_1 = arith.constant 0 : i32
    return %arg0, %c0_i32, %arg1, %c0_i32_0 : i32, i32, i32, i32
  }
  func.func @transform_8(%arg0: i32, %arg1: i32) -> (i32, i32, i32, i32) {
    %c0_i32 = arith.constant 0 : i32
    %c0_i32_0 = arith.constant 0 : i32
    %c0_i32_1 = arith.constant 0 : i32
    return %arg0, %c0_i32, %arg1, %c0_i32_0 : i32, i32, i32, i32
  }
}

</mosaic_0001>

<bundles_post_ra>
// kernel: tpu_custom_call.1
= control target key start
LH: loop header
LB: loop body
LE: loop exit
PB: predicated region body
PF: predicated region fallthrough
CT: control target
= control target key end

     0   :  { %s2382_s0 = inlined_call_operand.hbm [shape: bf16[2,4,8,8], index: 0, kind: input, shape index: {}]   ;;  %s2383_s1 = inlined_call_operand.hbm [shape: bf16[2,4,8,8], index: 1, kind: input, shape index: {}]   ;;  %s2384_s2 = inlined_call_operand.hbm [shape: bf16[2,4,8,8], index: 2, kind: input, shape index: {}]   ;;  %s2385_s3 = inlined_call_operand.vmem [shape: bf16[8,8], index: 3, kind: input, shape index: {}]   ;;  %s2386_s4 = inlined_call_operand.hbm [shape: bf16[8,8], index: 4, kind: input, shape index: {}]   ;;  %s2387_s5 = inlined_call_operand.vmem [shape: bf16[8,8], index: 5, kind: input, shape index: {}]   ;;  %s2388_s6 = inlined_call_operand.hbm [shape: bf16[2,4,8,8], index: 6, kind: output, shape index: {0}]   ;;  %s2389_s7 = inlined_call_operand.hbm [shape: bf16[2,4,8,8], index: 7, kind: output, shape index: {1}]   ;;  %s2390_s8 = inlined_call_operand.hbm [shape: bf16[2,4,8,8], index: 8, kind: output, shape index: {2}]  }
   0x1   :  { %2405 = sst [smem:[#allocation25_spill]] %s2382_s0 }
   0x2   :  { %2406 = sst [smem:[#allocation26_spill]] %s2383_s1 }
   0x3   :  { %14 = vsyncpa [#allocation3], 0 }
   0x4   :  { %16 = vsyncpa [#allocation3 + $0x1], 0 }
   0x5   :  { %17 = vsyncpa [#allocation6], 0 }
   0x6   :  { %19 = vsyncpa [#allocation6 + $0x1], 0 }
   0x7   :  { %20 = vsyncpa [#allocation9], 0 }
   0x8   :  { %21 = vsyncpa [#allocation4], 0 }
   0x9   :  { %23 = vsyncpa [#allocation4 + $0x1], 0 }
   0xa   :  { %24 = vsyncpa [#allocation12], 0 }
   0xb   :  { %26 = vsyncpa [#allocation12 + $0x1], 0  ;;  %s1925_s27 = smov 0   ;;  %s1927_s28 = smov 0  }
   0xc   :  { %s1929_s29 = smov 0   ;;  %s1931_s30 = smov 0  }
   0xd   :  { %s1933_s9 = smov 0   ;;  %s1935_s10 = smov 0  }
   0xe LB: > { %2407 = sst [smem:[#allocation19_spill]] %s1845_s27  ;;  %s44_s11 = sadd.s32 1, %s1861_s9  ;;  %s1865_s10 = sphi %s1935_s10, %s32_s10   ;;  %s1861_s9 = sphi %s1933_s9, %s2435_s9   ;;  %s1857_s30 = sphi %s1931_s30, %s2434_s30   ;;  %s1853_s29 = sphi %s1929_s29, %s2438_s29   ;;  %s1849_s28 = sphi %s1927_s28, %s2437_s28   ;;  %s1845_s27 = sphi %s1925_s27, %s2436_s27  }
   0xf   : > { %2408 = sst [smem:[#allocation20_spill]] %s1861_s9  ;;  %s53_s12 = sadd.s32 1, %s1853_s29 }
  0x10   : > { %2409 = sst [smem:[#allocation21_spill]] %s1865_s10  ;;  %p46_p0 = scmp.ge.s32.totalorder %s44_s11, 2 }
  0x11   : > { %p60_p1 = scmp.ne.s32.totalorder %s1853_s29, %s1849_s28  ;;  %p61_p2 = scmp.eq.s32.totalorder %s1865_s10, 0 }
  0x12   : > { %s2440_s11 = smov (%p46_p0, %s44_s11), 0  ;;  %p1553_p5 = scmp.lt.s32.totalorder %s1865_s10, 2 }
  0x13   : > { %2410 = sst [smem:[#allocation22_spill]] %s2440_s11  ;;  %p62_p4 = por %p61_p2, %p60_p1 }
  0x14   : > { %s48_s13 = ssub.s32 %s1861_s9, %s2440_s11  ;;  %s2391_s14 = sand.u32 1, %s1853_s29  }
  0x15   : > { %p51_p6 = scmp.eq.s32.totalorder %s48_s13, 0  ;;  %s1972_s15 = sshll.u32 %s2391_s14, 4 }
  0x16   : > { %s1975_s16 = sshll.u32 %s1861_s9, 8  ;;  %p1977_p7 = pnand %p1553_p5, %p62_p4 }
  0x17   : > { %s1982_s18 = scalar_select %p51_p6, %s1853_s29, %s53_s12  }
  0x18   : > { %s332_s19 = sand.u32 1, %s1865_s10   ;;  %s2413_s1 = sld [smem:[#allocation26_spill]] }
  0x19   : > { %2412 = sst [smem:[#allocation23_spill]] %s1982_s18  ;;  %s336_s23 = scalar_lea.vmem [#allocation5], %s1972_s15 }
  0x1a   : > { %s344_s24 = sshll.u32 %s336_s23, 4  ;;  %s1990_s25 = scalar_lea.sflag [#allocation6], %s332_s19  ;;  %s345_s24 = int_to_ptr.vmem [resolvable:$true] %s344_s24 }
  0x1b   : > { %p2404_p8 = pneg %p1977_p7  ;;  %s1624_s26 = scalar_lea.vmem %s345_s24, 256 }
  0x1c   : > { %p1625_p9 = scmp.ne.s32.totalorder %s345_s24, %s1624_s26  ;;  %s1867_s12 = smov [#allocation5]  }
  0x1d   : > { %s1629_s13 = sshll.u32 %s1867_s12, 4  ;;  %s1630_s13 = int_to_ptr.vmem [resolvable:$false] %s1629_s13 }
  0x1e   : > { %s343_s22 = scalar_lea.hbm %s2413_s1, %s1975_s16  ;;  %p1627_p10 = pnand %p1625_p9, %p2404_p8 }
  0x1f   : > { %s1631_s14 = scalar_lea.vmem %s1630_s13, 512  ;;  %p1632_p12 = scmp.lt.s32.totalorder %s345_s24, %s1630_s13 }
  0x20   : > { %p1628_p11 = pneg %p1627_p10  ;;  %p1633_p13 = scmp.lt.s32.totalorder %s1631_s14, %s1624_s26 }
  0x22   : > { %p1634_p0 = por %p1633_p13, %p1632_p12 }
  0x24   : > { %p1635_p2 = pnand %p1634_p0, %p1628_p11 }
  0x26   : > { %1638 = shalt.err (!%p1635_p2)
}
  0x27   : > { %s2393_s20 = smov 64   ;;  %s2395_s19 = smov 4  }
  0x28   : > { %1538 = dma.hbm_to_vmem [thread:$0]  (!%p1977_p7), %s343_s22, 256, %s345_s24, %s1990_s25, %s2393_s20, %s2393_s20, %s2395_s19  }
  0x29   : > { %s2004_s14 = sadd.s32 4294967295, %s1865_s10   ;;  %s2392_s21 = sadd.s32 4294967294, %s1865_s10  }
  0x2a   : > { %p66_p4 = scmp.ne.s32.totalorder %s1849_s28, %s1845_s27  ;;  %p2403_p5 = scmp.eq.s32.totalorder %s2004_s14, 0 }
  0x2b   : > { %p211_p6 = scmp.eq.s32.totalorder %s2004_s14, 1  ;;  %p217_p9 = scmp.eq.s32.totalorder %s2392_s21, 1 }
  0x2c   : > { %p1349_p10 = scmp.ge.s32.totalorder %s1865_s10, 1  ;;  %p2016_p11 = por %p2403_p5, %p66_p4 }
  0x2d   : > { %p2023_p12 = por %p211_p6, %p60_p1  ;;  %p2027_p13 = por %p217_p9, %p66_p4 }
  0x2e   : > { %p280_p0 = scmp.lt.s32.totalorder %s1865_s10, 3  ;;  %s1870_s12 = smov [#allocation8]  }
  0x2f   : > { %s2416_s24 = scalar_select %p2027_p13, 1, 0 }
  0x30   : > { %p2032_p2 = pnand %p1349_p10, %p280_p0  ;;  %s296_s13 = sshll.u32 %s1870_s12, 4  ;;  %s2036_s13 = int_to_ptr.vmem [resolvable:$true] %s296_s13 }
  0x31   : > { %2417 = sst [smem:[#allocation24_spill]] %s2416_s24  ;;  %s314_s1 = scalar_lea.vmem [#allocation2], %s1972_s15 }
  0x32   : > { %p1528_p1 = pneg %p2032_p2  ;;  %s2419_s0 = sld [smem:[#allocation25_spill]] }
  0x33   : > { %s322_s11 = sshll.u32 %s314_s1, 4  ;;  %s2421_s18 = sand.u32 1, %s1853_s29   ;;  %s323_s11 = int_to_ptr.vmem [resolvable:$true] %s322_s11 }
  0x34   : > { %p2047_p4 = pnand %p1528_p1, %p2403_p5  ;;  %s311_s10 = scalar_lea.sflag [#allocation3], %s2421_s18 }
  0x35   : > { %s1652_s24 = scalar_lea.vmem %s323_s11, 256  ;;  %s1871_s12 = smov [#allocation2]  }
  0x36   : > { %p1653_p6 = scmp.ne.s32.totalorder %s323_s11, %s1652_s24  ;;  %s1657_s27 = sshll.u32 %s1871_s12, 4  ;;  %s1658_s27 = int_to_ptr.vmem [resolvable:$false] %s1657_s27 }
  0x37   : > { %s1659_s20 = scalar_lea.vmem %s1658_s27, 512  ;;  %p1660_p0 = scmp.lt.s32.totalorder %s323_s11, %s1658_s27 }
  0x38   : > { %s321_s19 = scalar_lea.hbm %s2419_s0, %s1975_s16  ;;  %p1655_p9 = pnand %p1653_p6, %p2404_p8 }
  0x39   : > { %p1661_p3 = scmp.lt.s32.totalorder %s1659_s20, %s1652_s24 }
  0x3a   : > { %p1656_p10 = pneg %p1655_p9 }
  0x3b   : > { %p1662_p13 = por %p1661_p3, %p1660_p0 }
  0x3d   : > { %p1663_p1 = pnand %p1662_p13, %p1656_p10 }
  0x3f   : > { %1666 = shalt.err (!%p1663_p1)
}
  0x40   : > { %s2422_s1 = smov 4   ;;  %s2423_s21 = smov 64  }
  0x41   : > { %1535 = dma.hbm_to_vmem [thread:$0]  (!%p1977_p7), %s321_s19, 256, %s323_s11, %s311_s10, %s2423_s21, %s2423_s21, %s2422_s1  }
  0x42   : > { %p1669_p6 = pneg %p2047_p4  ;;  %s1678_s18 = scalar_lea.vmem %s2036_s13, 64 }
  0x43   : > { %p1679_p9 = scmp.ne.s32.totalorder %s2036_s13, %s1678_s18  ;;  %p1686_p3 = scmp.lt.s32.totalorder %s2036_s13, %s2036_s13 }
  0x44   : > { %p1687_p13 = scmp.lt.s32.totalorder %s1678_s18, %s1678_s18 }
  0x45   : > { %p1681_p5 = pnand %p1679_p9, %p1669_p6 }
  0x46   : > { %p1688_p10 = por %p1687_p13, %p1686_p3 }
  0x47   : > { %p1682_p8 = pneg %p1681_p5 }
  0x49   : > { %p1689_p0 = pnand %p1688_p10, %p1682_p8 }
  0x4b   : > { %1692 = shalt.err (!%p1689_p0)
}
  0x4c   : > { %1531 = dma.hbm_to_vmem [thread:$0]  (!%p2047_p4), %s2386_s4, 64, %s2036_s13, [#allocation9]  }
  0x4d   : > { %s365_s19 = scalar_lea.hbm %s2384_s2, %s1975_s16  ;;  %s358_s12 = scalar_lea.vmem [#allocation7], %s1972_s15 }
  0x4e   : > { %s366_s20 = sshll.u32 %s358_s12, 4  ;;  %p2424_p5 = pneg %p1977_p7  ;;  %s367_s20 = int_to_ptr.vmem [resolvable:$true] %s366_s20 }
  0x4f   : > { %s1706_s18 = scalar_lea.vmem %s367_s20, 256  ;;  %s1872_s9 = smov [#allocation7]  }
  0x50   : > { %p1707_p8 = scmp.ne.s32.totalorder %s367_s20, %s1706_s18  ;;  %s1711_s0 = sshll.u32 %s1872_s9, 4  ;;  %s1712_s0 = int_to_ptr.vmem [resolvable:$false] %s1711_s0 }
  0x51   : > { %s1713_s27 = scalar_lea.vmem %s1712_s0, 512  ;;  %p1714_p9 = scmp.lt.s32.totalorder %s367_s20, %s1712_s0 }
  0x52   : > { %p1709_p1 = pnand %p1707_p8, %p2424_p5  ;;  %p1715_p3 = scmp.lt.s32.totalorder %s1713_s27, %s1706_s18 }
  0x54   : > { %p1710_p6 = pneg %p1709_p1  ;;  %p1716_p4 = por %p1715_p3, %p1714_p9 }
  0x56   : > { %p1717_p13 = pnand %p1716_p4, %p1710_p6 }
  0x58   : > { %1720 = shalt.err (!%p1717_p13)
}
  0x59   : > { %1541 = dma.hbm_to_vmem [thread:$0]  (!%p1977_p7), %s365_s19, 256, %s367_s20, %s1990_s25, %s2423_s21, %s2423_s21, %s2422_s1  }
  0x5a   : > { %378 = sbr.rel (%p2032_p2) target bundleno = 395 (0x18b), region = 44  ;;  %s2090_s15 = sand.u32 (!%p2032_p2), 1, %s1849_s28  }
  0x5b   : > { %s2093_s0 = sshll.u32 (!%p2032_p2), %s2090_s15, 4  ;;  %s381_s16 = scalar_lea.sflag (!%p2032_p2), [#allocation3], %s2090_s15 }
  0x5c   : > { %s2097_s13 = scalar_lea.vmem (!%p2032_p2), [#allocation2], %s2093_s0 }
  0x5f   : > { %1824 = dma.done.wait (%p2016_p11), %s381_s16, 256  }
  0x60   : > { %1826 = vsyncadd (%p2016_p11), %s381_s16, 4294967040  ;;  %s389_s17 = sand.u32 1, %s2004_s14   ;;  %s2107_s26 = scalar_lea.vmem [#allocation5], %s2093_s0 }
  0x61   : > { %s390_s25 = scalar_lea.sflag [#allocation6], %s389_s17 }
  0x62   : > { %1828 = dma.done.wait (%p2016_p11), %s390_s25, 512  }
  0x63   : > { %1830 = vsyncadd (%p2016_p11), %s390_s25, 4294966784  ;;  %s2114_s1 = scalar_lea.vmem [#allocation7], %s2093_s0  ;;  %p2425_p7 = scmp.eq.s32.totalorder %s2004_s14, 0 }
  0x65   : > { %1832 = dma.done.wait (%p2425_p7), [#allocation9], 64   ;;  %p2426_p2 = pmov %p2425_p7 }
  0x66   : > { %v1873_v0 = vmov 0.0   ;;  %vm1874_vm0 = vmmov 0   ;;  %vm466_vm1 = vcmask 1043456   ;;  %v461_v1 = vld [vmem:[%s2385_s3] sm:$0xf]  ;;  %vm462_vm2 = vcmask 64512  }
  0x67   : > { %1834 = vsyncadd (%p2426_p2), [#allocation9], 4294967232  ;;  %1440 = vmatprep.subr.bf16.mxu0 %v1873_v0  ;;  %1446 = vmatprep.subr.bf16.mxu1 %v1873_v0  ;;  %v514_v2 = vld [vmem:[#allocation8] sm:$0xf]  ;;  %v468_v3 = vsel %vm466_vm1, %v461_v1, 0  ;;  %vm511_vm3 = vcmask 60416  }
  0x68   : > { %1442 = vmatprep.mubr.msk.bf16.mxu0 %vm1874_vm0, %v1873_v0  ;;  %1448 = vmatprep.mubr.msk.bf16.mxu1 %vm1874_vm0, %v1873_v0  ;;  %v519_v4 = vsel %vm466_vm1, %v514_v2, 0  ;;  %v564_v5 = vld [vmem:[%s2387_s5] sm:$0xf]  ;;  %v1372_v14 = vld [vmem:[%s2097_s13 + $0x4] sm:$0xf]  ;;  %s2243_s10 = sshll.u32 %s1857_s30, 8 }
  0x69   : > { %1441 = vmatpush3.bf16.msra.mxu0 %v468_v3  ;;  %1447 = vmatpush3.bf16.msra.mxu1 %v519_v4  ;;  %v460_v6 = vld [vmem:[%s2097_s13] sm:$0xf]  ;;  %v569_v9 = vsel %vm466_vm1, %v564_v5, 0  ;;  %v1375_v19 = vld [vmem:[%s2107_s26 + $0x4] sm:$0xf]  ;;  %s2251_s12 = scalar_lea.hbm %s2388_s6, %s2243_s10  ;;  %s1082_s30 = scalar_lea.sflag [#allocation4], %s2090_s15 }
  0x6a   : > { %v513_v7 = vld [vmem:[%s2107_s26] sm:$0xf]  ;;  %1452 = vmatprep.subr.bf16.mxu0 %v1873_v0  ;;  %1458 = vmatprep.subr.bf16.mxu1 %v1873_v0  ;;  %v1378_v20 = vld [vmem:[%s2114_s1 + $0x4] sm:$0xf]  ;;  %v1381_v25 = vld [vmem:[%s2097_s13 + $0x8] sm:$0xf] }
  0x6b   : > { %v615_v8 = vld [vmem:[%s2385_s3] sm:$0xf]  ;;  %v1384_v26 = vld [vmem:[%s2107_s26 + $0x8] sm:$0xf]  ;;  %v1390_v32 = vld [vmem:[%s2097_s13 + $0xc] sm:$0xf] }
  0x6c   : > { %v620_v10 = vsel %vm466_vm1, %v615_v8, 0  ;;  %1443 = vmatmul.mubr.msk.bf16.vlgmr.msra.gmra.mxu0 %vm462_vm2, %v460_v6  ;;  %1449 = vmatmul.mubr.msk.bf16.vlgmr.msra.gmra.mxu1 %vm462_vm2, %v513_v7  ;;  %v667_v11 = vld [vmem:[#allocation8] sm:$0xf]  ;;  %v1387_v31 = vld [vmem:[%s2114_s1 + $0x8] sm:$0xf]  ;;  %s2217_s13 = scalar_lea.vmem [#allocation10], %s2093_s0 }
  0x6d   : > { %1453 = vmatpush3.bf16.msra.mxu0 %v569_v9  ;;  %1459 = vmatpush3.bf16.msra.mxu1 %v620_v10  ;;  %v719_v12 = vld [vmem:[%s2387_s5] sm:$0xf]  ;;  %v672_v15 = vsel %vm466_vm1, %v667_v11, 0  ;;  %v1393_v35 = vld [vmem:[%s2107_s26 + $0xc] sm:$0xf]  ;;  %s2222_s26 = scalar_lea.vmem [#allocation11], %s2093_s0 }
  0x6e   : > { %1454 = vmatprep.mubr.msk.bf16.mxu0 %vm1874_vm0, %v1873_v0  ;;  %1460 = vmatprep.mubr.msk.bf16.mxu1 %vm1874_vm0, %v1873_v0  ;;  %v563_v13 = vld [vmem:[%s2114_s1] sm:$0xf]  ;;  %v724_v16 = vsel %vm466_vm1, %v719_v12, 0  ;;  %v1396_v36 = vld [vmem:[%s2114_s1 + $0xc] sm:$0xf]  ;;  %s2227_s1 = scalar_lea.vmem [#allocation13], %s2093_s0 }
  0x6f   : > { %1464 = vmatprep.subr.bf16.mxu0 %v1873_v0  ;;  %1470 = vmatprep.subr.bf16.mxu1 %v1873_v0  ;;  %v771_v17 = vld [vmem:[%s2385_s3] sm:$0xf]  ;;  %s1106_s0 = sshll.u32 %s2217_s13, 4  ;;  %s1875_s18 = smov [#allocation10]   ;;  %s2245_s0 = int_to_ptr.vmem [resolvable:$true] %s1106_s0 }
  0x70   : > { %v823_v18 = vld [vmem:[#allocation8] sm:$0xf]  ;;  %v776_v21 = vsel %vm466_vm1, %v771_v17, 0  ;;  %s1721_s20 = scalar_lea.vmem %s2245_s0, 256  ;;  %s1725_s9 = sshll.u32 %s1875_s18, 4  ;;  %s1726_s9 = int_to_ptr.vmem [resolvable:$false] %s1725_s9 }
  0x71   : > { %v828_v22 = vsel %vm466_vm1, %v823_v18, 0  ;;  %v875_v23 = vld [vmem:[%s2387_s5] sm:$0xf]  ;;  %p1722_p11 = scmp.ne.s32.totalorder %s2245_s0, %s1721_s20  ;;  %s1727_s27 = scalar_lea.vmem %s1726_s9, 512 }
  0x72   : > { %v927_v24 = vld [vmem:[%s2385_s3] sm:$0xf]  ;;  %v880_v27 = vsel %vm466_vm1, %v875_v23, 0  ;;  %p1728_p8 = scmp.lt.s32.totalorder %s2245_s0, %s1726_s9  ;;  %p1729_p5 = scmp.lt.s32.totalorder %s1727_s27, %s1721_s20 }
  0x73   : > { %v932_v28 = vsel %vm466_vm1, %v927_v24, 0  ;;  %v979_v29 = vld [vmem:[#allocation8] sm:$0xf]  ;;  %p1723_p10 = pnand %p1722_p11, %p2023_p12 }
  0x74   : > { %1455 = vmatmul.mubr.msk.bf16.vlgmr.msra.gmra.mxu0 %vm462_vm2, %v563_v13  ;;  %1461 = vmatmul.mubr.msk.bf16.vlgmr.msra.gmra.mxu1 %vm462_vm2, %v1372_v14  ;;  %v1031_v30 = vld [vmem:[%s2387_s5] sm:$0xf]  ;;  %v984_v33 = vsel %vm466_vm1, %v979_v29, 0  ;;  %p1730_p1 = por %p1729_p5, %p1728_p8 }
  0x75   : > { %1465 = vmatpush3.bf16.msra.mxu0 %v672_v15  ;;  %1471 = vmatpush3.bf16.msra.mxu1 %v724_v16  ;;  %v1036_v34 = vsel %vm466_vm1, %v1031_v30, 0  ;;  %p1724_p0 = pneg %p1723_p10 }
  0x76   : > { %1466 = vmatprep.mubr.msk.bf16.mxu0 %vm1874_vm0, %v1873_v0  ;;  %1472 = vmatprep.mubr.msk.bf16.mxu1 %vm1874_vm0, %v1873_v0 }
  0x77   : > { %1476 = vmatprep.subr.bf16.mxu0 %v1873_v0  ;;  %1482 = vmatprep.subr.bf16.mxu1 %v1873_v0  ;;  %p1731_p6 = pnand %p1730_p1, %p1724_p0 }
  0x7c   : > { %1467 = vmatmul.mubr.msk.bf16.vlgmr.msra.gmra.mxu0 %vm462_vm2, %v1375_v19  ;;  %1473 = vmatmul.mubr.msk.bf16.vlgmr.msra.gmra.mxu1 %vm462_vm2, %v1378_v20 }
  0x7d   : > { %1477 = vmatpush3.bf16.msra.mxu0 %v776_v21  ;;  %1483 = vmatpush3.bf16.msra.mxu1 %v828_v22 }
  0x7e   : > { %1478 = vmatprep.mubr.msk.bf16.mxu0 %vm1874_vm0, %v1873_v0  ;;  %1484 = vmatprep.mubr.msk.bf16.mxu1 %vm1874_vm0, %v1873_v0 }
  0x7f   : > { %1488 = vmatprep.subr.bf16.mxu0 %v1873_v0  ;;  %1494 = vmatprep.subr.bf16.mxu1 %v1873_v0 }
  0x84   : > { %1479 = vmatmul.mubr.msk.bf16.vlgmr.msra.gmra.mxu0 %vm462_vm2, %v1381_v25  ;;  %1485 = vmatmul.mubr.msk.bf16.vlgmr.msra.gmra.mxu1 %vm462_vm2, %v1384_v26 }
  0x85   : > { %1489 = vmatpush3.bf16.msra.mxu0 %v880_v27  ;;  %1495 = vmatpush3.bf16.msra.mxu1 %v932_v28 }
  0x86   : > { %1490 = vmatprep.mubr.msk.bf16.mxu0 %vm1874_vm0, %v1873_v0  ;;  %1496 = vmatprep.mubr.msk.bf16.mxu1 %vm1874_vm0, %v1873_v0 }
  0x87   : > { %1500 = vmatprep.subr.bf16.mxu0 %v1873_v0  ;;  %1506 = vmatprep.subr.bf16.mxu1 %v1873_v0 }
  0x8c   : > { %1491 = vmatmul.mubr.msk.bf16.vlgmr.msra.gmra.mxu0 %vm462_vm2, %v1387_v31  ;;  %1497 = vmatmul.mubr.msk.bf16.vlgmr.msra.gmra.mxu1 %vm462_vm2, %v1390_v32 }
  0x8d   : > { %1501 = vmatpush3.bf16.msra.mxu0 %v984_v33  ;;  %1507 = vmatpush3.bf16.msra.mxu1 %v1036_v34 }
  0x8e   : > { %1502 = vmatprep.mubr.msk.bf16.mxu0 %vm1874_vm0, %v1873_v0  ;;  %1508 = vmatprep.mubr.msk.bf16.mxu1 %vm1874_vm0, %v1873_v0 }
  0x94   : > { %1503 = vmatmul.mubr.msk.bf16.vlgmr.msra.gmra.mxu0 %vm462_vm2, %v1393_v35  ;;  %1509 = vmatmul.mubr.msk.bf16.vlgmr.msra.gmra.mxu1 %vm462_vm2, %v1396_v36 }
 0x12c   : > { %v504_v37 = vpop.f32.mrf.mxu0  ;;  %v555_v38 = vpop.f32.mrf.mxu1 }
 0x12d   : > { %v510_v39 = vpack.c.bf16 %v504_v37, %v504_v37  ;;  %v561_v40 = vpack.c.bf16 %v555_v38, %v555_v38 }
 0x12e   : > { %v1444_v41 = vpop.f32.mrf.mxu0  ;;  %v1450_v42 = vpop.f32.mrf.mxu1 }
 0x12f   : > { %512 = vst.msk [vmem:[%s2217_s13] sm:$0xf] %vm511_vm3, %v510_v39  ;;  %562 = vst.msk [vmem:[%s2222_s26] sm:$0xf] %vm511_vm3, %v561_v40 }
 0x130   : > { %v507_v43 = vpop.f32.mrf.mxu0  ;;  %v558_v44 = vpop.f32.mrf.mxu1 }
 0x132   : > { %v1445_v45 = vpop.f32.mrf.mxu0  ;;  %v1451_v46 = vpop.f32.mrf.mxu1 }
 0x134   : > { %v605_v47 = vpop.f32.mrf.mxu0  ;;  %v656_v48 = vpop.f32.mrf.mxu1 }
 0x135   : > { %v611_v49 = vpack.c.bf16 %v605_v47, %v605_v47  ;;  %v662_v50 = vpack.c.bf16 %v656_v48, %v656_v48 }
 0x136   : > { %v1456_v51 = vpop.f32.mrf.mxu0  ;;  %v1462_v52 = vpop.f32.mrf.mxu1 }
 0x137   : > { %612 = vst.msk [vmem:[%s2227_s1] sm:$0xf] %vm511_vm3, %v611_v49  ;;  %1374 = vst.msk [vmem:[%s2217_s13 + $0x4] sm:$0xf] %vm511_vm3, %v662_v50 }
 0x138   : > { %v608_v53 = vpop.f32.mrf.mxu0  ;;  %v659_v54 = vpop.f32.mrf.mxu1 }
 0x13a   : > { %v1457_v55 = vpop.f32.mrf.mxu0  ;;  %v1463_v56 = vpop.f32.mrf.mxu1 }
 0x13c   : > { %v708_v57 = vpop.f32.mrf.mxu0  ;;  %v760_v58 = vpop.f32.mrf.mxu1 }
 0x13d   : > { %v714_v59 = vpack.c.bf16 %v708_v57, %v708_v57  ;;  %v766_v60 = vpack.c.bf16 %v760_v58, %v760_v58 }
 0x13e   : > { %v1468_v61 = vpop.f32.mrf.mxu0  ;;  %v1474_v62 = vpop.f32.mrf.mxu1 }
 0x13f   : > { %1377 = vst.msk [vmem:[%s2222_s26 + $0x4] sm:$0xf] %vm511_vm3, %v714_v59  ;;  %1380 = vst.msk [vmem:[%s2227_s1 + $0x4] sm:$0xf] %vm511_vm3, %v766_v60 }
 0x140   : > { %v711_v63 = vpop.f32.mrf.mxu0  ;;  %v763_v0 = vpop.f32.mrf.mxu1 }
 0x142   : > { %v1469_v1 = vpop.f32.mrf.mxu0  ;;  %v1475_v2 = vpop.f32.mrf.mxu1 }
 0x144   : > { %v812_v3 = vpop.f32.mrf.mxu0  ;;  %v864_v4 = vpop.f32.mrf.mxu1 }
 0x145   : > { %v818_v5 = vpack.c.bf16 %v812_v3, %v812_v3  ;;  %v870_v6 = vpack.c.bf16 %v864_v4, %v864_v4 }
 0x146   : > { %v1480_v7 = vpop.f32.mrf.mxu0  ;;  %v1486_v8 = vpop.f32.mrf.mxu1 }
 0x147   : > { %1383 = vst.msk [vmem:[%s2217_s13 + $0x8] sm:$0xf] %vm511_vm3, %v818_v5  ;;  %1386 = vst.msk [vmem:[%s2222_s26 + $0x8] sm:$0xf] %vm511_vm3, %v870_v6 }
 0x148   : > { %v815_v9 = vpop.f32.mrf.mxu0  ;;  %v867_v10 = vpop.f32.mrf.mxu1 }
 0x14a   : > { %v1481_v11 = vpop.f32.mrf.mxu0  ;;  %v1487_v12 = vpop.f32.mrf.mxu1 }
 0x14c   : > { %v916_v13 = vpop.f32.mrf.mxu0  ;;  %v968_v14 = vpop.f32.mrf.mxu1 }
 0x14d   : > { %v922_v15 = vpack.c.bf16 %v916_v13, %v916_v13  ;;  %v974_v16 = vpack.c.bf16 %v968_v14, %v968_v14 }
 0x14e   : > { %v1492_v17 = vpop.f32.mrf.mxu0  ;;  %v1498_v18 = vpop.f32.mrf.mxu1 }
 0x14f   : > { %1389 = vst.msk [vmem:[%s2227_s1 + $0x8] sm:$0xf] %vm511_vm3, %v922_v15  ;;  %1392 = vst.msk [vmem:[%s2217_s13 + $0xc] sm:$0xf] %vm511_vm3, %v974_v16 }
 0x150   : > { %v919_v19 = vpop.f32.mrf.mxu0  ;;  %v971_v20 = vpop.f32.mrf.mxu1 }
 0x151   : > { %1734 = shalt.err (!%p1731_p6)
}
 0x152   : > { %s1735_s16 = scalar_lea.hbm %s2251_s12, 256  ;;  %s1739_s21 = scalar_lea.hbm %s2388_s6, 512 }
 0x153   : > { %p1736_p9 = scmp.ne.s32.totalorder %s2251_s12, %s1735_s16  ;;  %p1740_p13 = scmp.lt.s32.totalorder %s2251_s12, %s2388_s6 }
 0x154   : > { %p1741_p7 = scmp.lt.s32.totalorder %s1739_s21, %s1735_s16 }
 0x155   : > { %p1737_p3 = pnand %p1736_p9, %p2023_p12 }
 0x156   : > { %p1742_p2 = por %p1741_p7, %p1740_p13 }
 0x157   : > { %p1738_p4 = pneg %p1737_p3 }
 0x159   : > { %p1743_p11 = pnand %p1742_p2, %p1738_p4 }
 0x15b   : > { %1746 = shalt.err (!%p1743_p11)
}
 0x15c   : > { %s1876_s11 = smov 64   ;;  %s1877_s19 = smov 4   ;;  %v1493_v21 = vpop.f32.mrf.mxu0  ;;  %v1499_v22 = vpop.f32.mrf.mxu1 }
 0x15d   : > { %1522 = dma.vmem_to_hbm [thread:$0]  (%p2023_p12), %s2245_s0, 256, %s2251_s12, %s1082_s30, %s1876_s11, %s1876_s11, %s1877_s19  }
 0x15e   : > { %s1123_s20 = sshll.u32 %s2222_s26, 4  ;;  %s1140_s18 = sshll.u32 %s2227_s1, 4  ;;  %v1020_v23 = vpop.f32.mrf.mxu0  ;;  %v1072_v24 = vpop.f32.mrf.mxu1  ;;  %s2285_s20 = int_to_ptr.vmem [resolvable:$true] %s1123_s20  ;;  %s2293_s18 = int_to_ptr.vmem [resolvable:$true] %s1140_s18 }
 0x15f   : > { %v1026_v25 = vpack.c.bf16 %v1020_v23, %v1020_v23  ;;  %v1078_v26 = vpack.c.bf16 %v1072_v24, %v1072_v24  ;;  %s2291_s15 = scalar_lea.hbm %s2389_s7, %s2243_s10  ;;  %s2299_s30 = scalar_lea.hbm %s2390_s8, %s2243_s10 }
 0x160   : > { %v1504_v27 = vpop.f32.mrf.mxu0  ;;  %v1510_v28 = vpop.f32.mrf.mxu1  ;;  %s2307_s16 = scalar_lea.sflag [#allocation12], %s389_s17  ;;  %s1747_s25 = scalar_lea.vmem %s2285_s20, 256 }
 0x161   : > { %1395 = vst.msk [vmem:[%s2222_s26 + $0xc] sm:$0xf] %vm511_vm3, %v1026_v25  ;;  %1398 = vst.msk [vmem:[%s2227_s1 + $0xc] sm:$0xf] %vm511_vm3, %v1078_v26  ;;  %p1748_p10 = scmp.ne.s32.totalorder %s2285_s20, %s1747_s25  ;;  %s1878_s23 = smov [#allocation11]  }
 0x162   : > { %v1023_v29 = vpop.f32.mrf.mxu0  ;;  %v1075_v30 = vpop.f32.mrf.mxu1  ;;  %s1751_s21 = sshll.u32 %s1878_s23, 4  ;;  %s1752_s21 = int_to_ptr.vmem [resolvable:$false] %s1751_s21 }
 0x163   : > { %p1749_p0 = pnand %p1748_p10, %p2023_p12  ;;  %s1753_s24 = scalar_lea.vmem %s1752_s21, 512 }
 0x164   : > { %p1754_p5 = scmp.lt.s32.totalorder %s2285_s20, %s1752_s21  ;;  %p1755_p1 = scmp.lt.s32.totalorder %s1753_s24, %s1747_s25 }
 0x165   : > { %p1750_p8 = pneg %p1749_p0 }
 0x166   : > { %p1756_p6 = por %p1755_p1, %p1754_p5 }
 0x168   : > { %p1757_p9 = pnand %p1756_p6, %p1750_p8 }
 0x16a   : > { %1760 = shalt.err (!%p1757_p9)
}
 0x16b   : > { %s1761_s14 = scalar_lea.hbm %s2291_s15, 256  ;;  %s1765_s1 = scalar_lea.hbm %s2389_s7, 512 }
 0x16c   : > { %p1762_p3 = scmp.ne.s32.totalorder %s2291_s15, %s1761_s14  ;;  %p1766_p7 = scmp.lt.s32.totalorder %s2291_s15, %s2389_s7 }
 0x16d   : > { %p1767_p2 = scmp.lt.s32.totalorder %s1765_s1, %s1761_s14 }
 0x16e   : > { %p1763_p4 = pnand %p1762_p3, %p2023_p12 }
 0x16f   : > { %p1768_p11 = por %p1767_p2, %p1766_p7 }
 0x170   : > { %p1764_p13 = pneg %p1763_p4 }
 0x172   : > { %p1769_p10 = pnand %p1768_p11, %p1764_p13 }
 0x174   : > { %1772 = shalt.err (!%p1769_p10)
}
 0x175   : > { %1523 = dma.vmem_to_hbm [thread:$0]  (%p2023_p12), %s2285_s20, 256, %s2291_s15, %s2307_s16, %s1876_s11, %s1876_s11, %s1877_s19  }
 0x176   : > { %s1773_s9 = scalar_lea.vmem %s2293_s18, 256  ;;  %s1879_s27 = smov [#allocation13]  }
 0x177   : > { %p1774_p0 = scmp.ne.s32.totalorder %s2293_s18, %s1773_s9  ;;  %s1777_s0 = sshll.u32 %s1879_s27, 4  ;;  %s1778_s0 = int_to_ptr.vmem [resolvable:$false] %s1777_s0 }
 0x178   : > { %s1779_s12 = scalar_lea.vmem %s1778_s0, 512  ;;  %p1780_p1 = scmp.lt.s32.totalorder %s2293_s18, %s1778_s0 }
 0x179   : > { %p1775_p8 = pnand %p1774_p0, %p2023_p12  ;;  %p1781_p6 = scmp.lt.s32.totalorder %s1779_s12, %s1773_s9 }
 0x17b   : > { %p1776_p5 = pneg %p1775_p8  ;;  %p1782_p9 = por %p1781_p6, %p1780_p1 }
 0x17d   : > { %p1783_p3 = pnand %p1782_p9, %p1776_p5 }
 0x17f   : > { %1786 = shalt.err (!%p1783_p3)
}
 0x180   : > { %s1787_s25 = scalar_lea.hbm %s2299_s30, 256  ;;  %s1791_s23 = scalar_lea.hbm %s2390_s8, 512 }
 0x181   : > { %p1788_p4 = scmp.ne.s32.totalorder %s2299_s30, %s1787_s25  ;;  %p1792_p2 = scmp.lt.s32.totalorder %s2299_s30, %s2390_s8 }
 0x182   : > { %p1793_p11 = scmp.lt.s32.totalorder %s1791_s23, %s1787_s25 }
 0x183   : > { %p1789_p13 = pnand %p1788_p4, %p2023_p12 }
 0x184   : > { %p1794_p10 = por %p1793_p11, %p1792_p2 }
 0x185   : > { %p1790_p7 = pneg %p1789_p13 }
 0x187   : > { %p1795_p0 = pnand %p1794_p10, %p1790_p7 }
 0x189   : > { %1798 = shalt.err (!%p1795_p0)
}
 0x18a   : > { %1524 = dma.vmem_to_hbm [thread:$0]  (%p2023_p12), %s2293_s18, 256, %s2299_s30, %s2307_s16, %s1876_s11, %s1876_s11, %s1877_s19   ;;  %v1505_v31 = vpop.f32.mrf.mxu0  ;;  %v1511_v32 = vpop.f32.mrf.mxu1 }
 0x18b PF: > { %s2427_s14 = sld [smem:[#allocation19_spill]] }
 0x18c   : > { %s2428_s17 = sld [smem:[#allocation24_spill]] }
 0x18d   : > { %s2429_s26 = sld [smem:[#allocation21_spill]] }
 0x191   : > { %s1155_s1 = sand.u32 1, %s2427_s14  }
 0x192   : > { %p2430_p8 = scmp.ne.s32.totalorder %s2428_s17, 0  ;;  %s1156_s10 = scalar_lea.sflag [#allocation4], %s1155_s1 }
 0x193   : > { %p2431_p5 = scmp.ge.s32.totalorder %s2429_s26, 2 }
 0x195   : > { %p1543_p1 = pnand %p2431_p5, %p2430_p8 }
 0x197   : > { %p1544_p6 = pneg %p1543_p1 }
 0x199   : > { %1836 = dma.done.wait (%p1544_p6), %s1156_s10, 256  }
 0x19a   : > { %1838 = vsyncadd (%p1544_p6), %s1156_s10, 4294967040  ;;  %s2432_s22 = sadd.s32 4294967294, %s2429_s26  }
 0x19b   : > { %s1164_s13 = sand.u32 1, %s2432_s22  }
 0x19c   : > { %s1165_s9 = scalar_lea.sflag [#allocation12], %s1164_s13 }
 0x19d   : > { %1840 = dma.done.wait (%p1544_p6), %s1165_s9, 512  }
 0x19e   : > { %1842 = vsyncadd (%p1544_p6), %s1165_s9, 4294966784  ;;  %s32_s10 = sadd.s32 1, %s2429_s26   ;;  %s2433_s11 = sld [smem:[#allocation23_spill]] }
 0x19f   : > { %p29_p12 = scmp.ge.s32.totalorder %s32_s10, 4   ;;  %s2434_s30 = sld [smem:[#allocation20_spill]] }
 0x1a0   : > { %s2435_s9 = sld [smem:[#allocation22_spill]]  ;;  %s2436_s27 = smov %s1849_s28 }
 0x1a1   : > { %s2437_s28 = smov %s1853_s29  ;;  %31 = sbr.rel (!%p29_p12) target bundleno = 14 (0xe), region = 167 }
 0x1a4   : > { %s2438_s29 = smov %s2433_s11 }
 0x1a6   :  { %1179 = vsyncpa [#allocation3], 1 }
 0x1a7   :  { %1181 = vsyncpa [#allocation3 + $0x1], 1 }
 0x1a8   :  { %1182 = vsyncpa [#allocation6], 1 }
 0x1a9   :  { %1184 = vsyncpa [#allocation6 + $0x1], 1 }
 0x1aa   :  { %1185 = vsyncpa [#allocation9], 1 }
 0x1ab   :  { %1186 = vsyncpa [#allocation4], 1 }
 0x1ac   :  { %1188 = vsyncpa [#allocation4 + $0x1], 1 }
 0x1ad   :  { %1189 = vsyncpa [#allocation12], 1 }
 0x1ae   :  { %1191 = vsyncpa [#allocation12 + $0x1], 1 }

</bundles_post_ra>
